<compile_context>
chip_gen: v6e
topology: v6e:2x2x1
jax: 0.10.0
libtpu: 0.0.40
codegen_flags: <defaults>
</compile_context>

<pallas_src>
import functools

import jax
import jax.numpy as jnp
from jax import lax
from jax.experimental import pallas as pl
from jax.experimental.pallas import tpu as pltpu


def _embed_gather_kernel(tok_smem, table_hbm, out_ref, sem):
    # tok_smem:  [N_pad]  int32 token ids, resident in SMEM (scalar prefetch)
    # table_hbm: [V, E]   float32 embedding table, left in HBM (pl.ANY)
    # out_ref:   [T, E]   float32 output tile in VMEM (lane-dense last dim)
    # sem:       shared DMA semaphore for this tile's row copies
    tile = out_ref.shape[0]
    base = pl.program_id(0) * tile

    def issue(j, carry):
        row = tok_smem[base + j]
        pltpu.make_async_copy(
            table_hbm.at[pl.ds(row, 1)],   # [1, E] row of the table in HBM
            out_ref.at[pl.ds(j, 1)],       # [1, E] row of the output tile
            sem,
        ).start()
        return carry

    lax.fori_loop(0, tile, issue, 0)

    def drain(j, carry):
        # wait() only needs the per-copy transfer size (identical for all rows)
        pltpu.make_async_copy(
            table_hbm.at[pl.ds(0, 1)],
            out_ref.at[pl.ds(j, 1)],
            sem,
        ).wait()
        return carry

    lax.fori_loop(0, tile, drain, 0)


@functools.partial(jax.jit, static_argnames=("tile",))
def downstream_embed(tokens, table, *, tile=256):
    """tokens: int [B, S]; table: float32 [V, E] (row 0 == padding row)."""
    b, s = tokens.shape
    v, e = table.shape
    n = b * s

    # Token tile: multiple of 8, no larger than the (rounded-up) token count.
    # 256 amortizes the ~0.35 us per-grid-step overhead while keeping the
    # double-buffered output tile tiny in VMEM.
    t = min(tile, pl.cdiv(n, 8) * 8)
    t = max(8, (t // 8) * 8)
    n_pad = pl.cdiv(n, t) * t

    # Clamp ids like jnp.take / XLA gather; keeps every row DMA in bounds.
    tok = jnp.clip(tokens.reshape(n).astype(jnp.int32), 0, v - 1)
    if n_pad != n:
        tok = jnp.pad(tok, (0, n_pad - n))  # pad token 0 -> zero padding row

    out_flat = pl.pallas_call(
        _embed_gather_kernel,
        out_shape=jax.ShapeDtypeStruct((n_pad, e), table.dtype),
        grid_spec=pltpu.PrefetchScalarGridSpec(
            num_scalar_prefetch=1,                       # token ids -> SMEM
            grid=(n_pad // t,),
            in_specs=[
                pl.BlockSpec(memory_space=pl.ANY),       # table stays in HBM
            ],
            out_specs=pl.BlockSpec((t, e), lambda i, tok_ref: (i, 0)),
            scratch_shapes=[pltpu.SemaphoreType.DMA],
        ),
        compiler_params=pltpu.CompilerParams(
            dimension_semantics=("parallel",),
        ),
    )(tok, table)

    return out_flat[:n].reshape(b, s, e)


def init_params(key, vocab_size, embed_size):
    # Matches nn.Embedding default init (N(0,1)) with padding_idx=0 row zeroed.
    w = jax.random.normal(key, (vocab_size, embed_size), dtype=jnp.float32)
    w = w.at[0].set(0.0)
    return w


if __name__ == "__main__":
    key = jax.random.PRNGKey(0)
    k_tok, k_emb = jax.random.split(key)

    vocab_size = 32
    embed_size = 128
    batch, seq = 2, 8

    table = init_params(k_emb, vocab_size, embed_size)
    tokens = jax.random.randint(k_tok, (batch, seq), 0, vocab_size, dtype=jnp.int32)
    # make sure the padding token (0) appears so the zeroed row is exercised
    tokens = tokens.at[0, 0].set(0)

    out = downstream_embed(tokens, table)
    jax.block_until_ready(out)

    # correctness check against a plain-JAX gather
    ref = jnp.take(table, tokens, axis=0)
    assert out.shape == (batch, seq, embed_size)
    assert jnp.allclose(out, ref, atol=0.0), "mismatch vs reference gather"
    assert jnp.allclose(out[0, 0], 0.0), "padding_idx row must be zero"

    print("KERNEL_OK")
</pallas_src>

<mosaic_0001>
module attributes {stable_mosaic.version = 11 : i64} {
  func.func @_embed_gather_kernel(%arg0: i32, %arg1: memref<16xi32, #tpu.memory_space<smem>>, %arg2: memref<32x128xf32, #tpu.memory_space<any>>, %arg3: memref<16x128xf32, #tpu.memory_space<vmem>>, %arg4: memref<!tpu.dma_semaphore, #tpu.memory_space<semaphore_mem>>) attributes {dimension_semantics = [#tpu.dimension_semantics<parallel>], iteration_bounds = array<i64: 1>, scalar_prefetch = 1 : i64, scratch_operands = 1 : i64, tpu.core_type = #tpu.core_type<tc>, window_params = [{}, {transform_indices = @transform_1, window_bounds = array<i64: 16, 128>}]} {
    %c16_i32 = arith.constant 16 : i32
    %0 = arith.muli %arg0, %c16_i32 : i32
    %c0_i32 = arith.constant 0 : i32
    %c16_i32_0 = arith.constant 16 : i32
    %1 = arith.addi %c0_i32, %c16_i32_0 : i32
    %c1_i32 = arith.constant 1 : i32
    scf.for %arg5 = %c0_i32 to %1 step %c1_i32  : i32 {
      %3 = arith.addi %0, %arg5 : i32
      %4 = arith.index_cast %3 : i32 to index
      %5 = memref.load %arg1[%4] : memref<16xi32, #tpu.memory_space<smem>>
      %c0_i32_6 = arith.constant 0 : i32
      %6 = tpu.memref_slice %arg2[%5, %c0_i32_6] : memref<32x128xf32, #tpu.memory_space<any>> -> memref<1x128xf32, #tpu.memory_space<any>>
      %c0_i32_7 = arith.constant 0 : i32
      %7 = tpu.memref_slice %arg3[%arg5, %c0_i32_7] : memref<16x128xf32, #tpu.memory_space<vmem>> -> memref<1x128xf32, #tpu.memory_space<vmem>>
      tpu.enqueue_dma source(%6 : memref<1x128xf32, #tpu.memory_space<any>>) target(%7 : memref<1x128xf32, #tpu.memory_space<vmem>>) target_semaphore(%arg4 : memref<!tpu.dma_semaphore, #tpu.memory_space<semaphore_mem>>)
    }
    %c16_i32_1 = arith.constant 16 : i32
    %c0_i32_2 = arith.constant 0 : i32
    %c16_i32_3 = arith.constant 16 : i32
    %2 = arith.addi %c0_i32_2, %c16_i32_3 : i32
    %c1_i32_4 = arith.constant 1 : i32
    scf.for %arg5 = %c0_i32_2 to %2 step %c1_i32_4  : i32 {
      %c0_i32_6 = arith.constant 0 : i32
      %c0_i32_7 = arith.constant 0 : i32
      %3 = tpu.memref_slice %arg2[%c0_i32_6, %c0_i32_7] : memref<32x128xf32, #tpu.memory_space<any>> -> memref<1x128xf32, #tpu.memory_space<any>>
      %c0_i32_8 = arith.constant 0 : i32
      %4 = tpu.memref_slice %arg3[%arg5, %c0_i32_8] : memref<16x128xf32, #tpu.memory_space<vmem>> -> memref<1x128xf32, #tpu.memory_space<vmem>>
      tpu.wait_dma2 semaphore(%arg4 : memref<!tpu.dma_semaphore, #tpu.memory_space<semaphore_mem>>) src(%3 : memref<1x128xf32, #tpu.memory_space<any>>) dst(%4 : memref<1x128xf32, #tpu.memory_space<vmem>>)
    }
    %c16_i32_5 = arith.constant 16 : i32
    return
  }
  func.func @transform_1(%arg0: i32, %arg1: memref<16xi32, #tpu.memory_space<smem>>) -> (i32, i32) {
    %c0_i32 = arith.constant 0 : i32
    %c0_i32_0 = arith.constant 0 : i32
    return %arg0, %c0_i32 : i32, i32
  }
}

</mosaic_0001>

<bundles_post_ra>
// kernel: downstream_embed.1
= control target key start
LH: loop header
LB: loop body
LE: loop exit
PB: predicated region body
PF: predicated region fallthrough
CT: control target
= control target key end

     0   :  { %s231_s0 = inlined_call_operand.vmem [shape: s32[16], index: 0, kind: input, shape index: {}]   ;;  %s232_s1 = inlined_call_operand.hbm [shape: f32[32,128], index: 1, kind: input, shape index: {}]   ;;  %s233_s2 = inlined_call_operand.hbm [shape: f32[16,128], index: 2, kind: output, shape index: {}]  }
   0x1   :  { %s7_s11 = sshll.u32 %s231_s0, 4  ;;  %s8_s11 = int_to_ptr.vmem [resolvable:$true] %s7_s11 }
   0x2   :  { %s103_s12 = scalar_lea.vmem %s8_s11, 16  ;;  %p108_p1 = scmp.lt.s32.totalorder %s8_s11, %s8_s11 }
   0x3   :  { %p104_p0 = scmp.ne.s32.totalorder %s8_s11, %s103_s12  ;;  %p109_p2 = scmp.lt.s32.totalorder %s103_s12, %s103_s12 }
   0x5   :  { %p110_p3 = por %p109_p2, %p108_p1 }
   0x7   :  { %p111_p4 = pnand %p110_p3, %p104_p0 }
   0x9   :  { %114 = shalt.err (!%p111_p4)  }
   0xa   :  { %s179_s13 = smov [#allocation4]  }
   0xb   :  { %10 = dma.vmem_to_smem %s8_s11, 16, %s179_s13, [#allocation3] }
   0xc   :  { %165 = dma.done.wait [#allocation3], 16 }
   0xd   :  { %166 = vsyncadd [#allocation3], 4294967280 }
   0xe   :  { %12 = sfence }
   0xf   :  { %13 = vsyncpa [#allocation6], 0  ;;  %s201_s14 = smov 0  }
  0x10 LB: > { %s22_s0 = sld [smem:[#allocation4 + %s173_s14]]  ;;  %s25_s15 = scalar_lea.vmem [#allocation5], %s173_s14  ;;  %s173_s14 = sphi %s201_s14, %s20_s14  }
  0x11   : > { %s33_s16 = sshll.u32 %s25_s15, 4  ;;  %s117_s24 = scalar_lea.hbm %s232_s1, 512  ;;  %s34_s16 = int_to_ptr.vmem [resolvable:$true] %s33_s16 }
  0x16   : > { %s81_s17 = sshll.u32 %s22_s0, 4 }
  0x17   : > { %s24_s20 = scalar_lea.hbm %s232_s1, %s81_s17 }
  0x18   : > { %s115_s21 = scalar_lea.hbm %s24_s20, 16  ;;  %p118_p6 = scmp.lt.s32.totalorder %s24_s20, %s232_s1 }
  0x19   : > { %p116_p5 = scmp.ne.s32.totalorder %s24_s20, %s115_s21  ;;  %p119_p7 = scmp.lt.s32.totalorder %s117_s24, %s115_s21 }
  0x1b   : > { %p120_p8 = por %p119_p7, %p118_p6 }
  0x1d   : > { %p121_p9 = pnand %p120_p8, %p116_p5 }
  0x1f   : > { %124 = shalt.err (!%p121_p9)  }
  0x20   : > { %s125_s27 = scalar_lea.vmem %s34_s16, 16  ;;  %s180_s28 = smov [#allocation5]  }
  0x21   : > { %p126_p10 = scmp.ne.s32.totalorder %s34_s16, %s125_s27  ;;  %s127_s29 = sshll.u32 %s180_s28, 4  ;;  %s217_s29 = int_to_ptr.vmem [resolvable:$false] %s127_s29 }
  0x22   : > { %s129_s30 = scalar_lea.vmem %s217_s29, 256  ;;  %p130_p11 = scmp.lt.s32.totalorder %s34_s16, %s217_s29 }
  0x23   : > { %p131_p12 = scmp.lt.s32.totalorder %s129_s30, %s125_s27 }
  0x25   : > { %p132_p13 = por %p131_p12, %p130_p11 }
  0x27   : > { %p133_p0 = pnand %p132_p13, %p126_p10 }
  0x29   : > { %136 = shalt.err (!%p133_p0)  }
  0x2a   : > { %36 = dma.hbm_to_vmem [thread:$0]  %s24_s20, 16, %s34_s16, [#allocation2] }
  0x2b   : > { %s20_s14 = sadd.s32 1, %s173_s14  }
  0x2c   : > { %p17_p1 = scmp.ge.s32.totalorder %s20_s14, 16  }
  0x2d   :  { %s175_s3 = smov (%p17_p1), 0  }
  0x2e   :  { %19 = sbr.rel (!%p17_p1) target bundleno = 16 (0x10), region = 40 }
  0x33 LB: > { %167 = dma.done.wait [#allocation2], 16  ;;  %s177_s3 = sphi %s175_s3, %s42_s3  }
  0x34   : > { %168 = vsyncadd [#allocation2], 4294967280  ;;  %s42_s3 = sadd.s32 1, %s177_s3  }
  0x35   : > { %p39_p2 = scmp.ge.s32.totalorder %s42_s3, 16  }
  0x36   :  { %p138_p3 = scmp.ne.s32.totalorder (%p39_p2), %s217_s29, %s129_s30  ;;  %p142_p4 = scmp.lt.s32.totalorder (%p39_p2), %s217_s29, %s217_s29 }
  0x37   :  { %41 = sbr.rel (!%p39_p2) target bundleno = 51 (0x33), region = 51  ;;  %p143_p5 = scmp.lt.s32.totalorder (%p39_p2), %s129_s30, %s129_s30 }
  0x39   :  { %p144_p6 = por (%p39_p2), %p143_p5, %p142_p4 }
  0x3b   :  { %p145_p7 = pnand (%p39_p2), %p144_p6, %p138_p3 }
  0x3d   :  { %148 = shalt.err (!%p145_p7)
}
  0x3e   :  { %s181_s4 = smov 128   ;;  %s182_s1 = smov 8  }
  0x3f   :  { %57 = dma.vmem_to_hbm [thread:$0]  %s217_s29, 256, %s233_s2, [#allocation6], %s181_s4, %s181_s4, %s182_s1  }
  0x40   :  { %169 = dma.done.wait [#allocation6], 256  }
  0x41   :  { %170 = vsyncadd [#allocation6], 4294967040 }
  0x42   :  { %61 = vsyncpa [#allocation6], 1 }
  0x43   :  { %62 = vsyncmov [#allocation2] }
  0x46   :  { %s63_s7 = vpop.sfrf %62 }
  0x47   :  { %p82_p8 = scmp.ne.s32.totalorder %s63_s7, 0 }
  0x49   :  { %67 = shalt.err (%p82_p8)  }

</bundles_post_ra>
